<compile_context>
chip_gen: v7x
topology: tpu7x:2x2x1
jax: 0.10.0
libtpu: 0.0.40
codegen_flags: <defaults>
</compile_context>

<pallas_src>
import jax
import jax.numpy as jnp
from jax import lax
from jax.experimental import pallas as pl
from jax.experimental.pallas import tpu as pltpu

_LEAKY_SLOPE = 0.01  # torch nn.LeakyReLU default for the 'lr' activation


def _dwcnn_kernel(x_ref, wmat_ref, cb_ref, fcw_ref, fcb_ref, o_ref):
    # x_ref   : (1, TB, H*W)     one channel, one batch tile (lane-dense)
    # wmat_ref: (1, H*W, OH*OW)  conv-as-GEMM weights for this channel
    # cb_ref  : (1, 1, 1)        conv bias for this channel
    # fcw_ref : (1, 1, OH*OW)    per-channel FC weights
    # fcb_ref : (1, 1, 1)        per-channel FC bias
    # o_ref   : (1, TB, 1)
    x = x_ref[0]                                                  # (TB, HW)
    w = wmat_ref[0]                                               # (HW, OO)
    # depthwise conv as one MXU matmul, f32 accumulation
    h = jnp.dot(x, w, preferred_element_type=jnp.float32)         # (TB, OO)
    h = h + cb_ref[0]                                             # conv bias
    h = jnp.where(h > 0, h, _LEAKY_SLOPE * h)                     # LeakyReLU
    # per-channel fully-connected layer (out_features = 1) + sigmoid
    z = jnp.sum(h * fcw_ref[0], axis=-1, keepdims=True)           # (TB, 1)
    z = z + fcb_ref[0]
    o_ref[0] = jax.nn.sigmoid(z)


def _depthwise_conv_as_gemm(conv_w, H, W, SH, SW):
    """Scatter a (C, KH, KW) depthwise kernel into (C, H*W, OH*OW) GEMM weights."""
    C, KH, KW = conv_w.shape
    OH = (H - KH) // SH + 1
    OW = (W - KW) // SW + 1
    rows, cols = [], []
    for oh in range(OH):
        for ow in range(OW):
            o = oh * OW + ow
            for kh in range(KH):
                for kw in range(KW):
                    rows.append((oh * SH + kh) * W + (ow * SW + kw))
                    cols.append(o)
    rows = jnp.asarray(rows, dtype=jnp.int32)
    cols = jnp.asarray(cols, dtype=jnp.int32)
    vals = jnp.tile(conv_w.reshape(C, 1, KH * KW), (1, OH * OW, 1)).reshape(C, -1)
    wmat = jnp.zeros((C, H * W, OH * OW), dtype=conv_w.dtype)
    wmat = wmat.at[:, rows, cols].set(vals)
    return wmat, OH, OW


def dwcnn_classifier_forward(x, conv_w, conv_b, fc_w, fc_b, *, stride=(3, 3)):
    """x: (N, C, H, W) f32 -> (N, C, 1) f32 (depthwise conv + LeakyReLU + per-channel FC + sigmoid)."""
    N, C, H, W = x.shape
    SH, SW = stride
    wmat, OH, OW = _depthwise_conv_as_gemm(conv_w, H, W, SH, SW)
    HW, OO = H * W, OH * OW
    assert fc_w.shape == (C, OO), (fc_w.shape, (C, OO))

    # Batch tiling: whole batch per step when small (block dim == full dim is
    # legal); 512-row tiles (multiple of 8) otherwise so the double-buffered
    # per-step footprint stays small on every TPU generation.
    if N <= 512:
        TB, Np = N, N
    else:
        TB = 512
        Np = ((N + TB - 1) // TB) * TB
    xp = x if Np == N else jnp.pad(x, ((0, Np - N), (0, 0), (0, 0), (0, 0)))

    # Layout plumbing: channel-major, flattened spatial on the lane axis.
    x_r = jnp.transpose(xp.reshape(Np, C, HW), (1, 0, 2))   # (C, Np, HW)
    cb_r = conv_b.reshape(C, 1, 1)
    fcw_r = fc_w.reshape(C, 1, OO)
    fcb_r = fc_b.reshape(C, 1, 1)

    grid = (C, Np // TB)

    out = pl.pallas_call(
        _dwcnn_kernel,
        out_shape=jax.ShapeDtypeStruct((C, Np, 1), jnp.float32),
        grid=grid,
        in_specs=[
            pl.BlockSpec((1, TB, HW), lambda c, b: (c, b, 0)),   # x
            pl.BlockSpec((1, HW, OO), lambda c, b: (c, 0, 0)),   # conv-as-GEMM weights
            pl.BlockSpec((1, 1, 1), lambda c, b: (c, 0, 0)),     # conv bias
            pl.BlockSpec((1, 1, OO), lambda c, b: (c, 0, 0)),    # FC weights
            pl.BlockSpec((1, 1, 1), lambda c, b: (c, 0, 0)),     # FC bias
        ],
        out_specs=pl.BlockSpec((1, TB, 1), lambda c, b: (c, b, 0)),
        compiler_params=pltpu.CompilerParams(
            dimension_semantics=("parallel", "parallel"),
            vmem_limit_bytes=32 * 1024 * 1024,
        ),
        cost_estimate=pl.CostEstimate(
            flops=2 * C * Np * HW * OO + 4 * C * Np * OO,
            transcendentals=C * Np,
            bytes_accessed=4 * (C * Np * HW + C * HW * OO + C * Np + 3 * C),
        ),
    )(x_r, wmat, cb_r, fcw_r, fcb_r)

    # (C, Np, 1) -> (N, C, 1)
    return jnp.transpose(out, (1, 0, 2))[:N]


if __name__ == "__main__":
    key = jax.random.PRNGKey(0)
    k_x, k_cw, k_cb, k_fw, k_fb = jax.random.split(key, 5)

    # Small shapes consistent with default_config: C=16 channels, 5x5 kernel, stride 3.
    N, C, H, W = 2, 16, 16, 16
    KH = KW = 5
    SH = SW = 3
    OH = (H - KH) // SH + 1
    OW = (W - KW) // SW + 1

    x = jax.random.normal(k_x, (N, C, H, W), dtype=jnp.float32)
    conv_w = 0.1 * jax.random.normal(k_cw, (C, KH, KW), dtype=jnp.float32)
    conv_b = 0.1 * jax.random.normal(k_cb, (C,), dtype=jnp.float32)
    fc_w = jax.random.normal(k_fw, (C, OH * OW), dtype=jnp.float32) / jnp.sqrt(OH * OW)
    fc_b = 0.1 * jax.random.normal(k_fb, (C,), dtype=jnp.float32)

    out = dwcnn_classifier_forward(x, conv_w, conv_b, fc_w, fc_b, stride=(SH, SW))
    out = jax.block_until_ready(out)
    assert out.shape == (N, C, 1), out.shape

    # Pure-JAX reference (high precision) for correctness check.
    ref_conv = lax.conv_general_dilated(
        x, conv_w[:, None, :, :], window_strides=(SH, SW), padding="VALID",
        dimension_numbers=("NCHW", "OIHW", "NCHW"),
        feature_group_count=C, precision=lax.Precision.HIGHEST)
    ref_conv = ref_conv + conv_b[None, :, None, None]
    ref_act = jnp.where(ref_conv > 0, ref_conv, _LEAKY_SLOPE * ref_conv)
    ref_z = jnp.einsum("nco,co->nc", ref_act.reshape(N, C, OH * OW), fc_w,
                       precision=lax.Precision.HIGHEST) + fc_b[None, :]
    ref = jax.nn.sigmoid(ref_z)[..., None]

    err = jnp.max(jnp.abs(out - ref))
    assert jnp.allclose(out, ref, atol=2e-3, rtol=2e-3), f"mismatch vs reference, max abs err={err}"

    print("KERNEL_OK")
</pallas_src>

<mosaic_0001>
module attributes {stable_mosaic.version = 11 : i64} {
  func.func @_dwcnn_kernel(%arg0: i32, %arg1: i32, %arg2: memref<1x2x256xf32, #tpu.memory_space<vmem>>, %arg3: memref<1x256x16xf32, #tpu.memory_space<vmem>>, %arg4: memref<1x1x1xf32, #tpu.memory_space<vmem>>, %arg5: memref<1x1x16xf32, #tpu.memory_space<vmem>>, %arg6: memref<1x1x1xf32, #tpu.memory_space<vmem>>, %arg7: memref<1x2x1xf32, #tpu.memory_space<vmem>>) attributes {dimension_semantics = [#tpu.dimension_semantics<parallel>, #tpu.dimension_semantics<parallel>], iteration_bounds = array<i64: 16, 1>, scalar_prefetch = 0 : i64, scratch_operands = 0 : i64, tpu.core_type = #tpu.core_type<tc>, window_params = [{transform_indices = @transform_0, window_bounds = array<i64: 1, 2, 256>}, {transform_indices = @transform_1, window_bounds = array<i64: 1, 256, 16>}, {transform_indices = @transform_2, window_bounds = array<i64: 1, 1, 1>}, {transform_indices = @transform_3, window_bounds = array<i64: 1, 1, 16>}, {transform_indices = @transform_4, window_bounds = array<i64: 1, 1, 1>}, {transform_indices = @transform_5, window_bounds = array<i64: 1, 2, 1>}]} {
    %c0 = arith.constant 0 : index
    %c0_0 = arith.constant 0 : index
    %c0_1 = arith.constant 0 : index
    %0 = vector.load %arg2[%c0, %c0_0, %c0_1] : memref<1x2x256xf32, #tpu.memory_space<vmem>>, vector<1x2x256xf32>
    %1 = vector.shape_cast %0 : vector<1x2x256xf32> to vector<2x256xf32>
    %c0_2 = arith.constant 0 : index
    %c0_3 = arith.constant 0 : index
    %c0_4 = arith.constant 0 : index
    %2 = vector.load %arg3[%c0_2, %c0_3, %c0_4] : memref<1x256x16xf32, #tpu.memory_space<vmem>>, vector<1x256x16xf32>
    %3 = vector.shape_cast %2 : vector<1x256x16xf32> to vector<256x16xf32>
    %cst = arith.constant dense<0.000000e+00> : vector<2x16xf32>
    %4 = tpu.matmul %1, %3, %cst {dimension_numbers = #tpu.dot_dimension_numbers<[1], [0], [0], [1], [0, 0, 1, 1], [], []>} : vector<2x256xf32>, vector<256x16xf32>, vector<2x16xf32> -> vector<2x16xf32>
    %c0_5 = arith.constant 0 : index
    %c0_6 = arith.constant 0 : index
    %c0_7 = arith.constant 0 : index
    %5 = vector.load %arg4[%c0_5, %c0_6, %c0_7] : memref<1x1x1xf32, #tpu.memory_space<vmem>>, vector<1x1x1xf32>
    %6 = vector.shape_cast %5 : vector<1x1x1xf32> to vector<1x1xf32>
    %7 = vector.broadcast %6 : vector<1x1xf32> to vector<2x16xf32>
    %8 = arith.addf %4, %7 : vector<2x16xf32>
    %cst_8 = arith.constant 0.000000e+00 : f32
    %9 = vector.broadcast %cst_8 : f32 to vector<2x16xf32>
    %10 = arith.cmpf ogt, %8, %9 : vector<2x16xf32>
    %cst_9 = arith.constant 0.00999999977 : f32
    %11 = vector.broadcast %cst_9 : f32 to vector<2x16xf32>
    %12 = arith.mulf %11, %8 : vector<2x16xf32>
    %13 = arith.select %10, %8, %12 : vector<2x16xi1>, vector<2x16xf32>
    %c0_10 = arith.constant 0 : index
    %c0_11 = arith.constant 0 : index
    %c0_12 = arith.constant 0 : index
    %14 = vector.load %arg5[%c0_10, %c0_11, %c0_12] : memref<1x1x16xf32, #tpu.memory_space<vmem>>, vector<1x1x16xf32>
    %15 = vector.shape_cast %14 : vector<1x1x16xf32> to vector<1x16xf32>
    %16 = vector.broadcast %15 : vector<1x16xf32> to vector<2x16xf32>
    %17 = arith.mulf %13, %16 : vector<2x16xf32>
    %cst_13 = arith.constant dense<0.000000e+00> : vector<2xf32>
    %18 = vector.multi_reduction <add>, %17, %cst_13 [1] : vector<2x16xf32> to vector<2xf32>
    %19 = vector.shape_cast %18 : vector<2xf32> to vector<2x1xf32>
    %c0_14 = arith.constant 0 : index
    %c0_15 = arith.constant 0 : index
    %c0_16 = arith.constant 0 : index
    %20 = vector.load %arg6[%c0_14, %c0_15, %c0_16] : memref<1x1x1xf32, #tpu.memory_space<vmem>>, vector<1x1x1xf32>
    %21 = vector.shape_cast %20 : vector<1x1x1xf32> to vector<1x1xf32>
    %22 = vector.broadcast %21 : vector<1x1xf32> to vector<2x1xf32>
    %23 = arith.addf %19, %22 : vector<2x1xf32>
    %24 = arith.negf %23 : vector<2x1xf32>
    %25 = math.exp %24 : vector<2x1xf32>
    %cst_17 = arith.constant 1.000000e+00 : f32
    %26 = vector.broadcast %cst_17 : f32 to vector<2x1xf32>
    %27 = arith.addf %26, %25 : vector<2x1xf32>
    %28 = arith.divf %26, %27 : vector<2x1xf32>
    %c0_18 = arith.constant 0 : index
    %c0_19 = arith.constant 0 : index
    %c0_20 = arith.constant 0 : index
    %29 = vector.load %arg7[%c0_18, %c0_19, %c0_20] : memref<1x2x1xf32, #tpu.memory_space<vmem>>, vector<1x2x1xf32>
    %30 = vector.shape_cast %29 : vector<1x2x1xf32> to vector<2x1xf32>
    %31 = vector.shape_cast %28 : vector<2x1xf32> to vector<1x2x1xf32>
    tpu.vector_store %arg7[%c0_18, %c0_19, %c0_20], %31 {strides = array<i32>} : memref<1x2x1xf32, #tpu.memory_space<vmem>>, vector<1x2x1xf32>,
    return
  }
  func.func @transform_0(%arg0: i32, %arg1: i32) -> (i32, i32, i32) {
    %c0_i32 = arith.constant 0 : i32
    %c0_i32_0 = arith.constant 0 : i32
    return %arg0, %arg1, %c0_i32 : i32, i32, i32
  }
  func.func @transform_1(%arg0: i32, %arg1: i32) -> (i32, i32, i32) {
    %c0_i32 = arith.constant 0 : i32
    %c0_i32_0 = arith.constant 0 : i32
    %c0_i32_1 = arith.constant 0 : i32
    return %arg0, %c0_i32, %c0_i32_0 : i32, i32, i32
  }
  func.func @transform_2(%arg0: i32, %arg1: i32) -> (i32, i32, i32) {
    %c0_i32 = arith.constant 0 : i32
    %c0_i32_0 = arith.constant 0 : i32
    %c0_i32_1 = arith.constant 0 : i32
    return %arg0, %c0_i32, %c0_i32_0 : i32, i32, i32
  }
  func.func @transform_3(%arg0: i32, %arg1: i32) -> (i32, i32, i32) {
    %c0_i32 = arith.constant 0 : i32
    %c0_i32_0 = arith.constant 0 : i32
    %c0_i32_1 = arith.constant 0 : i32
    return %arg0, %c0_i32, %c0_i32_0 : i32, i32, i32
  }
  func.func @transform_4(%arg0: i32, %arg1: i32) -> (i32, i32, i32) {
    %c0_i32 = arith.constant 0 : i32
    %c0_i32_0 = arith.constant 0 : i32
    %c0_i32_1 = arith.constant 0 : i32
    return %arg0, %c0_i32, %c0_i32_0 : i32, i32, i32
  }
  func.func @transform_5(%arg0: i32, %arg1: i32) -> (i32, i32, i32) {
    %c0_i32 = arith.constant 0 : i32
    %c0_i32_0 = arith.constant 0 : i32
    return %arg0, %arg1, %c0_i32 : i32, i32, i32
  }
}

</mosaic_0001>

<bundles_post_ra>
// kernel: tpu_custom_call.1
= control target key start
LH: loop header
LB: loop body
LE: loop exit
PB: predicated region body
PF: predicated region fallthrough
CT: control target
= control target key end

     0   :  { %s764_s18 = smov 0   ;;  %s766_s19 = smov 0   ;;  %s851_s0 = inlined_call_operand.vmem [shape: f32[16,2,256], index: 0, kind: input, shape index: {}]   ;;  %s852_s1 = inlined_call_operand.vmem [shape: f32[16,256,16], index: 1, kind: input, shape index: {}]   ;;  %s853_s2 = inlined_call_operand.vmem [shape: f32[16,1,1], index: 2, kind: input, shape index: {}]   ;;  %s854_s3 = inlined_call_operand.vmem [shape: f32[16,1,16], index: 3, kind: input, shape index: {}]   ;;  %s855_s4 = inlined_call_operand.vmem [shape: f32[16,1,1], index: 4, kind: input, shape index: {}]   ;;  %s856_s5 = inlined_call_operand.vmem [shape: f32[16,2,1], index: 5, kind: output, shape index: {}]  }
   0x1   :  { %s768_s20 = smov 0  }
   0x2 LB: > { %s27_s21 = sadd.s32 1, %s727_s19  ;;  %p597_p0 = scmp.ge.s32.totalorder %s731_s20, 1  ;;  %s731_s20 = sphi %s768_s20, %s15_s20   ;;  %s727_s19 = sphi %s766_s19, %s858_s19   ;;  %s723_s18 = sphi %s764_s18, %s857_s18  }
   0x3   : > { %p29_p1 = scmp.ge.s32.totalorder %s27_s21, 16  ;;  %p241_p2 = scmp.lt.s32.totalorder %s731_s20, 17 }
   0x5   : > { %s860_s21 = smov (%p29_p1, %s27_s21), 0  ;;  %p242_p3 = pnand %p597_p0, %p241_p2 }
   0x6   : > { %p289_p4 = scmp.lt.s32.totalorder (!%p242_p3), %s723_s18, 15  ;;  %v733_v0 = vmov (!%p242_p3), 0   ;;  %vm454_vm1 = vcmask (!%p242_p3), 123904   ;;  %vm472_vm2 = vcmask (!%p242_p3), 1024  }
   0x7   : > { %245 = sbr.rel (%p242_p3) target bundleno = 446 (0x1be), region = 40  ;;  %704 = vset.pattern.permute.xlu0 (!%p242_p3), %v733_v0 }
   0xe   : > { %s862_s18 = smov (!%p289_p4, %s723_s18), 15 }
   0xf   : > { %s611_s22 = sshll.u32 %s862_s18, 8  ;;  %s610_s26 = sshll.u32 %s862_s18, 2 }
  0x10   : > { %s788_s25 = scalar_lea.vmem %s852_s1, %s611_s22  ;;  %s297_s29 = scalar_lea.vmem %s851_s0, %s610_s26 }
  0x11   : > { %v336_v1 = vld [vmem:[%s788_s25 + $0x80] sm:$0xff]  ;;  %v337_v2 = vld [vmem:[%s788_s25 + $0x88] sm:$0xff]  ;;  %v338_v6 = vld [vmem:[%s788_s25 + $0x90] sm:$0xff]  ;;  %s305_s7 = scalar_lea.vmem %s853_s2, %s862_s18  ;;  %s308_s10 = scalar_lea.vmem %s854_s3, %s862_s18 }
  0x12   : > { %v320_v3 = vld [vmem:[%s788_s25] sm:$0xff]  ;;  %v647_v4 = vpack.c.bf16 %v337_v2, %v336_v1  ;;  %v321_v5 = vld [vmem:[%s788_s25 + $0x8] sm:$0xff]  ;;  %v339_v7 = vld [vmem:[%s788_s25 + $0x98] sm:$0xff]  ;;  %s311_s13 = scalar_lea.vmem %s855_s4, %s862_s18  ;;  %s602_s14 = sshll.u32 %s862_s18, 1 }
  0x13   : > { %v649_v8 = vpack.c.bf16 %v321_v5, %v320_v3  ;;  %v651_v9 = vpack.c.bf16 %v339_v7, %v338_v6  ;;  %v322_v10 = vld [vmem:[%s788_s25 + $0x10] sm:$0xff]  ;;  %v323_v11 = vld [vmem:[%s788_s25 + $0x18] sm:$0xff]  ;;  %v340_v12 = vld [vmem:[%s788_s25 + $0xa0] sm:$0xff]  ;;  %s318_s17 = scalar_lea.vmem %s856_s5, %s602_s14 }
  0x14   : > { %648 = vmatprep.subr.bf16.mxu0 %v647_v4  ;;  %v341_v13 = vld [vmem:[%s788_s25 + $0xa8] sm:$0xff]  ;;  %v653_v14 = vpack.c.bf16 %v323_v11, %v322_v10  ;;  %v324_v16 = vld [vmem:[%s788_s25 + $0x20] sm:$0xff]  ;;  %v342_v18 = vld [vmem:[%s788_s25 + $0xb0] sm:$0xff] }
  0x15   : > { %650 = vmatpush3.bf16.msra.mxu0 %v649_v8  ;;  %v655_v15 = vpack.c.bf16 %v341_v13, %v340_v12  ;;  %v325_v17 = vld [vmem:[%s788_s25 + $0x28] sm:$0xff]  ;;  %v343_v19 = vld [vmem:[%s788_s25 + $0xb8] sm:$0xff]  ;;  %v326_v22 = vld [vmem:[%s788_s25 + $0x30] sm:$0xff] }
  0x16   : > { %652 = vmatprep.subr.bf16.mxu0 %v651_v9  ;;  %v657_v20 = vpack.c.bf16 %v325_v17, %v324_v16  ;;  %v659_v21 = vpack.c.bf16 %v343_v19, %v342_v18  ;;  %v327_v23 = vld [vmem:[%s788_s25 + $0x38] sm:$0xff]  ;;  %v344_v24 = vld [vmem:[%s788_s25 + $0xc0] sm:$0xff]  ;;  %v345_v25 = vld [vmem:[%s788_s25 + $0xc8] sm:$0xff] }
  0x17   : > { %v604_v26 = vld.sshfl [vmem:[%s297_s29] sm:$0x33 pattern:$0x76325410]  ;;  %v661_v29 = vpack.c.bf16 %v327_v23, %v326_v22  ;;  %v663_v30 = vpack.c.bf16 %v345_v25, %v344_v24  ;;  %v329_v32 = vld [vmem:[%s788_s25 + $0x48] sm:$0xff]  ;;  %v346_v33 = vld [vmem:[%s788_s25 + $0xd0] sm:$0xff] }
  0x18   : > { %v370_v27 = vcombine.high %v604_v26, %v604_v26  ;;  %v603_v28 = vld [vmem:[%s305_s7] ss:$0 sm:$0xff]  ;;  %v347_v34 = vld [vmem:[%s788_s25 + $0xd8] sm:$0xff]  ;;  %v330_v37 = vld [vmem:[%s788_s25 + $0x50] sm:$0xff] }
  0x19   : > { %654 = vmatpush3.bf16.msra.mxu0 %v653_v14  ;;  %359 = vperm.xlu0 %704, %v603_v28   ;;  %v328_v31 = vld [vmem:[%s788_s25 + $0x40] sm:$0xff]  ;;  %v667_v36 = vpack.c.bf16 %v347_v34, %v346_v33  ;;  %v331_v38 = vld [vmem:[%s788_s25 + $0x58] sm:$0xff]  ;;  %v349_v40 = vld [vmem:[%s788_s25 + $0xe8] sm:$0xff] }
  0x1a   : > { %656 = vmatprep.subr.bf16.mxu0 %v655_v15  ;;  %437 = vmatprep.mubr.f32.mxu0 %v370_v27  ;;  %v665_v35 = vpack.c.bf16 %v329_v32, %v328_v31  ;;  %v348_v39 = vld [vmem:[%s788_s25 + $0xe0] sm:$0xff]  ;;  %v669_v41 = vpack.c.bf16 %v331_v38, %v330_v37  ;;  %v333_v44 = vld [vmem:[%s788_s25 + $0x68] sm:$0xff]  ;;  %v350_v45 = vld [vmem:[%s788_s25 + $0xf0] sm:$0xff] }
  0x1b   : > { %v671_v42 = vpack.c.bf16 %v349_v40, %v348_v39  ;;  %v332_v43 = vld [vmem:[%s788_s25 + $0x60] sm:$0xff]  ;;  %v351_v46 = vld [vmem:[%s788_s25 + $0xf8] sm:$0xff]  ;;  %v334_v49 = vld [vmem:[%s788_s25 + $0x70] sm:$0xff] }
  0x1c   : > { %v673_v47 = vpack.c.bf16 %v333_v44, %v332_v43  ;;  %v675_v48 = vpack.c.bf16 %v351_v46, %v350_v45  ;;  %v335_v50 = vld [vmem:[%s788_s25 + $0x78] sm:$0xff]  ;;  %v605_v58 = vld [vmem:[%s308_s10] ss:$0 sm:$0xff] }
  0x1d   : > { %658 = vmatpush3.bf16.msra.mxu0 %v657_v20  ;;  %v677_v51 = vpack.c.bf16 %v335_v50, %v334_v49  ;;  %v606_v62 = vld [vmem:[%s311_s13] ss:$0 sm:$0xff] }
  0x1e   : > { %660 = vmatprep.subr.bf16.mxu0 %v659_v21 }
  0x21   : > { %662 = vmatpush3.bf16.msra.mxu0 %v661_v29 }
  0x22   : > { %664 = vmatprep.subr.bf16.mxu0 %v663_v30 }
  0x25   : > { %666 = vmatpush3.bf16.msra.mxu0 %v665_v35 }
  0x26   : > { %668 = vmatprep.subr.bf16.mxu0 %v667_v36 }
  0x29   : > { %670 = vmatpush3.bf16.msra.mxu0 %v669_v41 }
  0x2a   : > { %672 = vmatprep.subr.bf16.mxu0 %v671_v42 }
  0x2d   : > { %674 = vmatpush3.bf16.msra.mxu0 %v673_v47 }
  0x2e   : > { %676 = vmatprep.subr.bf16.mxu0 %v675_v48 }
  0x31   : > { %678 = vmatpush3.bf16.msra.mxu0 %v677_v51 }
  0x34   : > { %438 = vmatmul.mubr.f32.vlgmr.msra.gmra.mrb[0].mxu0 %v604_v26 }
  0x98   : > { %v360_v54 = vpop.permute.xlu0 %359 }
 0x107   : > { %v644_v52 = vpop.f32.mrb[0].mxu0 }
 0x108   : > { %v645_v53 = vpop.f32.mrb[1].mxu0 }
 0x109   : > { %v646_v55 = vadd.f32 %v645_v53, %v644_v52 }
 0x10b   : > { %v440_v56 = vadd.f32 %v646_v55, %v360_v54 }
 0x10d   : > { %vm443_vm0 = vcmp.gt.f32.partialorder %v440_v56, 0.0  ;;  %v444_v57 = vmul.f32 0.01, %v440_v56 }
 0x10f   : > { %v445_v59 = vsel %vm443_vm0, %v440_v56, %v444_v57 }
 0x110   : > { %v453_v60 = vmul.f32 %v605_v58, %v445_v59 }
 0x112   : > { %v455_v61 = vsel %vm454_vm1, %v453_v60, 0.0 }
 0x113   : > { %456 = vadd.xlane.f32.xlu0 %v455_v61 }
 0x1a0   : > { %v457_v63 = vpop.xlane.xlu0 %456 }
 0x1a1   : > { %v465_v0 = vadd.f32 %v606_v62, %v457_v63 }
 0x1a3   : > { %v607_v1 = vmul.f32 -1.442695, %v465_v0 }
 0x1a5   : > { %705 = vpow2.f32 %v607_v1 }
 0x1af   : > { %v706_v2 = vpop.eup %705 }
 0x1b0   : > { %v469_v3 = vadd.f32 1.0, %v706_v2 }
 0x1b2   : > { %707 = vrcp.f32 %v469_v3 }
 0x1bc   : > { %v708_v4 = vpop.eup %707 }
 0x1bd   : > { %473 = vst.msk [vmem:[%s318_s17] sm:$0x3] %vm472_vm2, %v708_v4 }
 0x1be PF: > { %s15_s20 = sadd.s32 1, %s731_s20   ;;  %s857_s18 = smov %s727_s19 }
 0x1bf   : > { %p12_p5 = scmp.ge.s32.totalorder %s15_s20, 18   ;;  %s858_s19 = smov %s860_s21 }
 0x1c1   :  { %14 = sbr.rel (!%p12_p5) target bundleno = 2 (0x2), region = 82 }

</bundles_post_ra>
